<compile_context>
chip_gen: v7x
topology: tpu7x:2x2x1
jax: 0.10.0
libtpu: 0.0.40
codegen_flags: <defaults>
</compile_context>

<pallas_src>
import jax
import jax.numpy as jnp
from jax import lax
from jax.experimental import pallas as pl
from jax.experimental.pallas import tpu as pltpu

LN_EPS = 1e-5
_INV_SQRT2 = 0.7071067811865476


def _round_up(x, m):
    return ((x + m - 1) // m) * m


def _layernorm_f32(x, gamma, beta):
    mean = jnp.mean(x, axis=-1, keepdims=True)
    xc = x - mean
    var = jnp.mean(xc * xc, axis=-1, keepdims=True)
    return xc * lax.rsqrt(var + LN_EPS) * gamma + beta


def _gelu_f32(h):
    # Exact erf form (matches torch.nn.GELU default).
    return 0.5 * h * (1.0 + lax.erf(h * _INV_SQRT2))


def mlp_kernel_single(x_ref, params_ref, b1_ref, w1_ref, w2_ref, o_ref):
    """Whole hidden dim resident: one pass per row tile, no scratch."""
    x = x_ref[...].astype(jnp.float32)
    gamma = params_ref[0:1, :]
    beta = params_ref[1:2, :]
    b2 = params_ref[2:3, :]

    xn = _layernorm_f32(x, gamma, beta)

    h = jnp.dot(xn.astype(w1_ref.dtype), w1_ref[...],
                preferred_element_type=jnp.float32)
    h = _gelu_f32(h + b1_ref[...].astype(jnp.float32))

    # TODO(synk): Dropout is identity in eval-mode forward; training-mode dropout
    # would use pltpu.prng_seed / pltpu.prng_random_bits with a seed input.

    out = jnp.dot(h.astype(w2_ref.dtype), w2_ref[...],
                  preferred_element_type=jnp.float32)
    o_ref[...] = (out + b2).astype(o_ref.dtype)


def mlp_kernel_tiled(x_ref, params_ref, b1_ref, w1_ref, w2_ref, o_ref,
                     xn_ref, acc_ref):
    """Grid: (row_tiles [parallel], hidden_tiles [arbitrary/reduction])."""
    k = pl.program_id(1)

    @pl.when(k == 0)
    def _init():
        x = x_ref[...].astype(jnp.float32)
        gamma = params_ref[0:1, :]
        beta = params_ref[1:2, :]
        xn = _layernorm_f32(x, gamma, beta)
        # Cache normalized tile (bf16) for all hidden tiles of this row tile.
        xn_ref[...] = xn.astype(xn_ref.dtype)
        acc_ref[...] = jnp.zeros_like(acc_ref)

    # Linear(d_model -> h_tile): bf16 MXU inputs, f32 accumulation.
    h = jnp.dot(xn_ref[...], w1_ref[...], preferred_element_type=jnp.float32)
    h = _gelu_f32(h + b1_ref[...].astype(jnp.float32))

    # Linear(h_tile -> d_model): accumulate partial products over hidden tiles.
    acc_ref[...] += jnp.dot(h.astype(w2_ref.dtype), w2_ref[...],
                            preferred_element_type=jnp.float32)

    @pl.when(k == pl.num_programs(1) - 1)
    def _finalize():
        b2 = params_ref[2:3, :]
        o_ref[...] = (acc_ref[...] + b2).astype(o_ref.dtype)


def mlp_forward(x, gamma, beta, w1, b1, w2, b2, *,
                tile_m=256, tile_h=512, matmul_dtype=jnp.bfloat16):
    """x: (B, S, d_model) -> (B, S, d_model)."""
    B, S, d_model = x.shape
    d_in, h_dim = w1.shape
    assert d_in == d_model and w2.shape == (h_dim, d_model)

    N = B * S
    # Large MXU-friendly row tile by default, but don't blow up tiny inputs.
    tm = min(tile_m, _round_up(N, 8))
    n_pad = _round_up(N, tm)

    x2 = x.reshape(N, d_model)
    if n_pad != N:
        # Zero-pad rows; padded rows produce finite garbage (var+eps > 0) and
        # are sliced off below.
        x2 = jnp.pad(x2, ((0, n_pad - N), (0, 0)))

    # Pack gamma/beta/b2 into a single lane-dense (3, d_model) f32 operand.
    params = jnp.stack([gamma, beta, b2]).astype(jnp.float32)
    b1_2 = b1.reshape(1, h_dim).astype(jnp.float32)

    # bf16 weights: halves HBM->VMEM traffic & VMEM footprint, hits MXU bf16 peak.
    w1_c = w1.astype(matmul_dtype)
    w2_c = w2.astype(matmul_dtype)

    if h_dim <= tile_h:
        # ---------- single-pass path: whole hidden dim in one tile ----------
        grid = (n_pad // tm,)
        out = pl.pallas_call(
            mlp_kernel_single,
            out_shape=jax.ShapeDtypeStruct((n_pad, d_model), x.dtype),
            grid_spec=pltpu.PrefetchScalarGridSpec(
                num_scalar_prefetch=0,
                grid=grid,
                in_specs=[
                    pl.BlockSpec((tm, d_model), lambda i: (i, 0)),    # x rows
                    pl.BlockSpec((3, d_model), lambda i: (0, 0)),     # gamma/beta/b2
                    pl.BlockSpec((1, h_dim), lambda i: (0, 0)),       # b1
                    pl.BlockSpec((d_model, h_dim), lambda i: (0, 0)),  # w1
                    pl.BlockSpec((h_dim, d_model), lambda i: (0, 0)),  # w2
                ],
                out_specs=pl.BlockSpec((tm, d_model), lambda i: (i, 0)),
            ),
            compiler_params=pltpu.CompilerParams(
                dimension_semantics=("parallel",),
            ),
        )(x2, params, b1_2, w1_c, w2_c)
    else:
        # ---------- hidden-tiled reduction path ----------
        th = tile_h
        assert th % 128 == 0, "tile_h must be a multiple of 128"
        h_pad = _round_up(h_dim, th)
        if h_pad != h_dim:
            # Zero-pad hidden dim: padded w1 cols / b1 entries / w2 rows
            # contribute GELU(0) @ 0 == 0 to the output.
            pad = h_pad - h_dim
            w1_c = jnp.pad(w1_c, ((0, 0), (0, pad)))
            b1_2 = jnp.pad(b1_2, ((0, 0), (0, pad)))
            w2_c = jnp.pad(w2_c, ((0, pad), (0, 0)))

        grid = (n_pad // tm, h_pad // th)
        out = pl.pallas_call(
            mlp_kernel_tiled,
            out_shape=jax.ShapeDtypeStruct((n_pad, d_model), x.dtype),
            grid_spec=pltpu.PrefetchScalarGridSpec(
                num_scalar_prefetch=0,
                grid=grid,
                in_specs=[
                    pl.BlockSpec((tm, d_model), lambda i, k: (i, 0)),     # x rows
                    pl.BlockSpec((3, d_model), lambda i, k: (0, 0)),      # gamma/beta/b2
                    pl.BlockSpec((1, th), lambda i, k: (0, k)),           # b1 tile
                    pl.BlockSpec((d_model, th), lambda i, k: (0, k)),     # w1 tile
                    pl.BlockSpec((th, d_model), lambda i, k: (k, 0)),     # w2 tile
                ],
                out_specs=pl.BlockSpec((tm, d_model), lambda i, k: (i, 0)),
                scratch_shapes=[
                    pltpu.VMEM((tm, d_model), matmul_dtype),   # cached normalized x
                    pltpu.VMEM((tm, d_model), jnp.float32),    # output accumulator
                ],
            ),
            compiler_params=pltpu.CompilerParams(
                dimension_semantics=("parallel", "arbitrary"),
            ),
        )(x2, params, b1_2, w1_c, w2_c)

    return out[:N].reshape(B, S, d_model)


def _ref_mlp(x, gamma, beta, w1, b1, w2, b2):
    mu = jnp.mean(x, axis=-1, keepdims=True)
    var = jnp.mean((x - mu) ** 2, axis=-1, keepdims=True)
    xn = (x - mu) * lax.rsqrt(var + LN_EPS) * gamma + beta
    h = xn @ w1 + b1
    h = 0.5 * h * (1.0 + lax.erf(h / jnp.sqrt(2.0)))
    return h @ w2 + b2


if __name__ == "__main__":
    key = jax.random.PRNGKey(0)

    def make_case(k, B, S, d_model, h_dim):
        kx, kw1, kb1, kw2, kb2 = jax.random.split(k, 5)
        x = jax.random.normal(kx, (B, S, d_model), dtype=jnp.float32)
        gamma = jnp.ones((d_model,), dtype=jnp.float32)   # torch LayerNorm defaults
        beta = jnp.zeros((d_model,), dtype=jnp.float32)
        w1 = jax.random.normal(kw1, (d_model, h_dim), dtype=jnp.float32) * 0.02
        b1 = jax.random.normal(kb1, (h_dim,), dtype=jnp.float32) * 0.02
        w2 = jax.random.normal(kw2, (h_dim, d_model), dtype=jnp.float32) * 0.02
        b2 = jax.random.normal(kb2, (d_model,), dtype=jnp.float32) * 0.02
        return x, gamma, beta, w1, b1, w2, b2

    k1, k2 = jax.random.split(key)

    # Case 1: small ViT-ish shapes (single-pass path). batch=2, seq=8, d=32, h=64
    args1 = make_case(k1, 2, 8, 32, 64)
    out1 = mlp_forward(*args1)
    jax.block_until_ready(out1)
    ref1 = _ref_mlp(*args1)
    assert out1.shape == args1[0].shape
    assert jnp.allclose(out1, ref1, atol=2e-2, rtol=2e-2), (
        float(jnp.max(jnp.abs(out1 - ref1))))

    # Case 2: exercises the hidden-tiled reduction path + hidden padding.
    args2 = make_case(k2, 2, 8, 128, 320)
    out2 = mlp_forward(*args2, tile_h=128)
    jax.block_until_ready(out2)
    ref2 = _ref_mlp(*args2)
    assert out2.shape == args2[0].shape
    assert jnp.allclose(out2, ref2, atol=2e-2, rtol=2e-2), (
        float(jnp.max(jnp.abs(out2 - ref2))))

    print("KERNEL_OK")
</pallas_src>

<mosaic_0001>
module attributes {stable_mosaic.version = 11 : i64} {
  func.func @mlp_kernel_single(%arg0: i32, %arg1: memref<16x32xf32, #tpu.memory_space<vmem>>, %arg2: memref<3x32xf32, #tpu.memory_space<vmem>>, %arg3: memref<1x64xf32, #tpu.memory_space<vmem>>, %arg4: memref<32x64xbf16, #tpu.memory_space<vmem>>, %arg5: memref<64x32xbf16, #tpu.memory_space<vmem>>, %arg6: memref<16x32xf32, #tpu.memory_space<vmem>>) attributes {dimension_semantics = [#tpu.dimension_semantics<parallel>], iteration_bounds = array<i64: 1>, scalar_prefetch = 0 : i64, scratch_operands = 0 : i64, tpu.core_type = #tpu.core_type<tc>, window_params = [{transform_indices = @transform_0, window_bounds = array<i64: 16, 32>}, {pipeline_mode = #tpu.pipeline_mode<synchronous>, transform_indices = @transform_1, window_bounds = array<i64: 3, 32>}, {pipeline_mode = #tpu.pipeline_mode<synchronous>, transform_indices = @transform_2, window_bounds = array<i64: 1, 64>}, {pipeline_mode = #tpu.pipeline_mode<synchronous>, transform_indices = @transform_3, window_bounds = array<i64: 32, 64>}, {pipeline_mode = #tpu.pipeline_mode<synchronous>, transform_indices = @transform_4, window_bounds = array<i64: 64, 32>}, {transform_indices = @transform_5, window_bounds = array<i64: 16, 32>}]} {
    %c0 = arith.constant 0 : index
    %c0_0 = arith.constant 0 : index
    %0 = vector.load %arg1[%c0, %c0_0] : memref<16x32xf32, #tpu.memory_space<vmem>>, vector<16x32xf32>
    %c0_1 = arith.constant 0 : index
    %c0_2 = arith.constant 0 : index
    %1 = vector.load %arg2[%c0_1, %c0_2] : memref<3x32xf32, #tpu.memory_space<vmem>>, vector<1x32xf32>
    %c1 = arith.constant 1 : index
    %c0_3 = arith.constant 0 : index
    %2 = vector.load %arg2[%c1, %c0_3] : memref<3x32xf32, #tpu.memory_space<vmem>>, vector<1x32xf32>
    %c2 = arith.constant 2 : index
    %c0_4 = arith.constant 0 : index
    %3 = vector.load %arg2[%c2, %c0_4] : memref<3x32xf32, #tpu.memory_space<vmem>>, vector<1x32xf32>
    %cst = arith.constant dense<0.000000e+00> : vector<16xf32>
    %4 = vector.multi_reduction <add>, %0, %cst [1] : vector<16x32xf32> to vector<16xf32>
    %5 = vector.shape_cast %4 : vector<16xf32> to vector<16x1xf32>
    %cst_5 = arith.constant 3.200000e+01 : f32
    %6 = vector.broadcast %cst_5 : f32 to vector<16x1xf32>
    %7 = arith.divf %5, %6 : vector<16x1xf32>
    %8 = vector.broadcast %7 : vector<16x1xf32> to vector<16x32xf32>
    %9 = arith.subf %0, %8 : vector<16x32xf32>
    %10 = arith.mulf %9, %9 : vector<16x32xf32>
    %cst_6 = arith.constant dense<0.000000e+00> : vector<16xf32>
    %11 = vector.multi_reduction <add>, %10, %cst_6 [1] : vector<16x32xf32> to vector<16xf32>
    %12 = vector.shape_cast %11 : vector<16xf32> to vector<16x1xf32>
    %cst_7 = arith.constant 3.200000e+01 : f32
    %13 = vector.broadcast %cst_7 : f32 to vector<16x1xf32>
    %14 = arith.divf %12, %13 : vector<16x1xf32>
    %cst_8 = arith.constant 9.99999974E-6 : f32
    %15 = vector.broadcast %cst_8 : f32 to vector<16x1xf32>
    %16 = arith.addf %14, %15 : vector<16x1xf32>
    %17 = math.rsqrt %16 : vector<16x1xf32>
    %18 = vector.broadcast %17 : vector<16x1xf32> to vector<16x32xf32>
    %19 = arith.mulf %9, %18 : vector<16x32xf32>
    %20 = vector.broadcast %1 : vector<1x32xf32> to vector<16x32xf32>
    %21 = arith.mulf %19, %20 : vector<16x32xf32>
    %22 = vector.broadcast %2 : vector<1x32xf32> to vector<16x32xf32>
    %23 = arith.addf %21, %22 : vector<16x32xf32>
    %24 = arith.truncf %23 : vector<16x32xf32> to vector<16x32xbf16>
    %c0_9 = arith.constant 0 : index
    %c0_10 = arith.constant 0 : index
    %25 = vector.load %arg4[%c0_9, %c0_10] : memref<32x64xbf16, #tpu.memory_space<vmem>>, vector<32x64xbf16>
    %cst_11 = arith.constant dense<0.000000e+00> : vector<16x64xf32>
    %26 = tpu.matmul %24, %25, %cst_11 {dimension_numbers = #tpu.dot_dimension_numbers<[1], [0], [0], [1], [0, 0, 1, 1], [], []>} : vector<16x32xbf16>, vector<32x64xbf16>, vector<16x64xf32> -> vector<16x64xf32>
    %c0_12 = arith.constant 0 : index
    %c0_13 = arith.constant 0 : index
    %27 = vector.load %arg3[%c0_12, %c0_13] : memref<1x64xf32, #tpu.memory_space<vmem>>, vector<1x64xf32>
    %28 = vector.broadcast %27 : vector<1x64xf32> to vector<16x64xf32>
    %29 = arith.addf %26, %28 : vector<16x64xf32>
    %cst_14 = arith.constant 5.000000e-01 : f32
    %30 = vector.broadcast %cst_14 : f32 to vector<16x64xf32>
    %31 = arith.mulf %30, %29 : vector<16x64xf32>
    %cst_15 = arith.constant 0.707106769 : f32
    %32 = vector.broadcast %cst_15 : f32 to vector<16x64xf32>
    %33 = arith.mulf %29, %32 : vector<16x64xf32>
    %34 = math.erf %33 : vector<16x64xf32>
    %cst_16 = arith.constant 1.000000e+00 : f32
    %35 = vector.broadcast %cst_16 : f32 to vector<16x64xf32>
    %36 = arith.addf %35, %34 : vector<16x64xf32>
    %37 = arith.mulf %31, %36 : vector<16x64xf32>
    %38 = arith.truncf %37 : vector<16x64xf32> to vector<16x64xbf16>
    %c0_17 = arith.constant 0 : index
    %c0_18 = arith.constant 0 : index
    %39 = vector.load %arg5[%c0_17, %c0_18] : memref<64x32xbf16, #tpu.memory_space<vmem>>, vector<64x32xbf16>
    %cst_19 = arith.constant dense<0.000000e+00> : vector<16x32xf32>
    %40 = tpu.matmul %38, %39, %cst_19 {dimension_numbers = #tpu.dot_dimension_numbers<[1], [0], [0], [1], [0, 0, 1, 1], [], []>} : vector<16x64xbf16>, vector<64x32xbf16>, vector<16x32xf32> -> vector<16x32xf32>
    %41 = vector.broadcast %3 : vector<1x32xf32> to vector<16x32xf32>
    %42 = arith.addf %40, %41 : vector<16x32xf32>
    %c0_20 = arith.constant 0 : index
    %c0_21 = arith.constant 0 : index
    %43 = vector.load %arg6[%c0_20, %c0_21] : memref<16x32xf32, #tpu.memory_space<vmem>>, vector<16x32xf32>
    tpu.vector_store %arg6[%c0_20, %c0_21], %42 {strides = array<i32>} : memref<16x32xf32, #tpu.memory_space<vmem>>, vector<16x32xf32>,
    return
  }
  func.func @transform_0(%arg0: i32) -> (i32, i32) {
    %c0_i32 = arith.constant 0 : i32
    %c0_i32_0 = arith.constant 0 : i32
    return %arg0, %c0_i32 : i32, i32
  }
  func.func @transform_1(%arg0: i32) -> (i32, i32) {
    %c0_i32 = arith.constant 0 : i32
    %c0_i32_0 = arith.constant 0 : i32
    %c0_i32_1 = arith.constant 0 : i32
    return %c0_i32, %c0_i32_0 : i32, i32
  }
  func.func @transform_2(%arg0: i32) -> (i32, i32) {
    %c0_i32 = arith.constant 0 : i32
    %c0_i32_0 = arith.constant 0 : i32
    %c0_i32_1 = arith.constant 0 : i32
    return %c0_i32, %c0_i32_0 : i32, i32
  }
  func.func @transform_3(%arg0: i32) -> (i32, i32) {
    %c0_i32 = arith.constant 0 : i32
    %c0_i32_0 = arith.constant 0 : i32
    %c0_i32_1 = arith.constant 0 : i32
    return %c0_i32, %c0_i32_0 : i32, i32
  }
  func.func @transform_4(%arg0: i32) -> (i32, i32) {
    %c0_i32 = arith.constant 0 : i32
    %c0_i32_0 = arith.constant 0 : i32
    %c0_i32_1 = arith.constant 0 : i32
    return %c0_i32, %c0_i32_0 : i32, i32
  }
  func.func @transform_5(%arg0: i32) -> (i32, i32) {
    %c0_i32 = arith.constant 0 : i32
    %c0_i32_0 = arith.constant 0 : i32
    return %arg0, %c0_i32 : i32, i32
  }
}

</mosaic_0001>

<bundles_post_ra>
// kernel: tpu_custom_call.1
= control target key start
LH: loop header
LB: loop body
LE: loop exit
PB: predicated region body
PF: predicated region fallthrough
CT: control target
= control target key end

     0   :  { %vm27_vm0 = vcmask 261120   ;;  %s418_s0 = inlined_call_operand.vmem [shape: f32[16,32], index: 0, kind: input, shape index: {}]   ;;  %s419_s1 = inlined_call_operand.vmem [shape: f32[3,32], index: 1, kind: input, shape index: {}]   ;;  %s420_s2 = inlined_call_operand.vmem [shape: f32[1,64], index: 2, kind: input, shape index: {}]   ;;  %s421_s3 = inlined_call_operand.vmem [shape: bf16[32,64], index: 3, kind: input, shape index: {}]   ;;  %s422_s4 = inlined_call_operand.vmem [shape: bf16[64,32], index: 4, kind: input, shape index: {}]   ;;  %s423_s5 = inlined_call_operand.hbm [shape: f32[16,32], index: 5, kind: output, shape index: {}]  }
   0x1   :  { %v22_v0 = vld [vmem:[%s418_s0] sm:$0xff]  ;;  %v23_v1 = vld [vmem:[%s418_s0 + $0x8] sm:$0xff] }
   0x2   :  { %v28_v2 = vsel %vm27_vm0, %v22_v0, 0.0  ;;  %v31_v3 = vsel %vm27_vm0, %v23_v1, 0.0 }
   0x3   :  { %29 = vadd.xlane.f32.xlu0 %v28_v2 }
   0x4   :  { %10 = vsyncpa [#allocation3], 0  ;;  %v290_v14 = vld [vmem:[%s421_s3] sm:$0xff]   ;;  %v328_v15 = vmov 0.0   ;;  %v291_v16 = vld [vmem:[%s421_s3 + $0x8] sm:$0xff]   ;;  %vm329_vm1 = vmmov 0  }
   0x5   :  { %265 = vmatprep.subr.bf16.mxu0 %v328_v15  ;;  %273 = vmatprep.subr.bf16.mxu1 %v328_v15  ;;  %v245_v25 = vld [vmem:[%s419_s1] ss:$0 sm:$0xff]  ;;  %v246_v29 = vld [vmem:[%s419_s1 + $0x1] ss:$0 sm:$0xff]  ;;  %v293_v35 = vld [vmem:[%s422_s4 + $0x8] sm:$0xff]   ;;  %vm182_vm2 = vcmask 523264  }
   0x6   :  { %266 = vmatpush3.bf16.msra.mxu0 %v290_v14  ;;  %269 = vmatprep.mubr.msk.bf16.mxu0 %vm329_vm1, %v328_v15  ;;  %v292_v34 = vld [vmem:[%s422_s4] sm:$0xff]   ;;  %v294_v36 = vld [vmem:[%s422_s4 + $0x10] sm:$0xff]   ;;  %v295_v37 = vld [vmem:[%s422_s4 + $0x18] sm:$0xff]   ;;  %s330_s13 = smov [#allocation2]  }
   0x7   :  { %32 = vadd.xlane.f32.xlu0 %v31_v3  ;;  %267 = vmatprep.subr.bf16.mxu0 %v328_v15  ;;  %v247_v38 = vld [vmem:[%s420_s2] ss:$0 sm:$0xff]  ;;  %v251_v56 = vld [vmem:[%s419_s1 + $0x2] ss:$0 sm:$0xff]  ;;  %s234_s14 = sshll.u32 %s330_s13, 4  ;;  %s235_s14 = int_to_ptr.vmem [resolvable:$true] %s234_s14 }
   0x8   :  { %281 = vmatprep.mubr.msk.bf16.mxu1 %vm329_vm1, %v328_v15  ;;  %274 = vmatpush3.bf16.msra.mxu1 %v292_v34  ;;  %s304_s15 = scalar_lea.vmem %s235_s14, 256  ;;  %p309_p1 = scmp.lt.s32.totalorder %s235_s14, %s235_s14 }
   0x9   :  { %275 = vmatprep.subr.bf16.mxu1 %v328_v15  ;;  %p305_p0 = scmp.ne.s32.totalorder %s235_s14, %s304_s15  ;;  %p310_p2 = scmp.lt.s32.totalorder %s304_s15, %s304_s15 }
   0xa   :  { %268 = vmatpush3.bf16.msra.mxu0 %v291_v16 }
   0xb   :  { %p311_p3 = por %p310_p2, %p309_p1 }
   0xc   :  { %276 = vmatpush3.bf16.msra.mxu1 %v293_v35 }
   0xd   :  { %277 = vmatprep.subr.bf16.mxu1 %v328_v15  ;;  %p312_p4 = pnand %p311_p3, %p305_p0 }
  0x10   :  { %278 = vmatpush3.bf16.msra.mxu1 %v294_v36 }
  0x11   :  { %279 = vmatprep.subr.bf16.mxu1 %v328_v15 }
  0x14   :  { %280 = vmatpush3.bf16.msra.mxu1 %v295_v37 }
  0x90   :  { %v30_v4 = vpop.xlane.xlu0 %29 }
  0x91   :  { %v35_v5 = vmul.f32 0.03125, %v30_v4 }
  0x93   :  { %v37_v6 = vsub.f32 %v22_v0, %v35_v5 }
  0x94   :  { %v33_v7 = vpop.xlane.xlu0 %32 }
  0x95   :  { %v36_v8 = vmul.f32 0.03125, %v33_v7  ;;  %v39_v9 = vmul.f32 %v37_v6, %v37_v6 }
  0x97   :  { %v38_v10 = vsub.f32 %v23_v1, %v36_v8  ;;  %v41_v11 = vsel %vm27_vm0, %v39_v9, 0.0 }
  0x98   :  { %42 = vadd.xlane.f32.xlu1 %v41_v11 }
  0x99   :  { %v40_v12 = vmul.f32 %v38_v10, %v38_v10 }
  0x9b   :  { %v44_v13 = vsel %vm27_vm0, %v40_v12, 0.0 }
  0x9c   :  { %45 = vadd.xlane.f32.xlu1 %v44_v13 }
 0x125   :  { %v43_v17 = vpop.xlane.xlu1 %42 }
 0x126   :  { %v47_v18 = vmul.f32 0.03125, %v43_v17 }
 0x128   :  { %v49_v19 = vadd.f32 1e-05, %v47_v18 }
 0x129   :  { %v46_v20 = vpop.xlane.xlu1 %45 }
 0x12a   :  { %296 = vrsqrt.f32 %v49_v19  ;;  %v48_v21 = vmul.f32 0.03125, %v46_v20 }
 0x12c   :  { %v50_v22 = vadd.f32 1e-05, %v48_v21 }
 0x12e   :  { %298 = vrsqrt.f32 %v50_v22 }
 0x134   :  { %v297_v23 = vpop.eup %296 }
 0x135   :  { %v53_v24 = vmul.f32 %v297_v23, %v37_v6 }
 0x137   :  { %v59_v28 = vmul.f32 %v245_v25, %v53_v24 }
 0x138   :  { %v299_v26 = vpop.eup %298 }
 0x139   :  { %v54_v27 = vmul.f32 %v299_v26, %v38_v10  ;;  %v65_v31 = vadd.f32 %v246_v29, %v59_v28 }
 0x13b   :  { %v60_v30 = vmul.f32 %v245_v25, %v54_v27 }
 0x13d   :  { %v66_v32 = vadd.f32 %v246_v29, %v60_v30 }
 0x13f   :  { %v67_v33 = vpack.c.bf16 %v66_v32, %v65_v31 }
 0x141   :  { %270 = vmatmul.mubr.msk.bf16.vlgmr.msra.gmra.mrb[0].mxu0 %vm27_vm0, %v67_v33 }
 0x214   :  { %v128_v39 = vpop.f32.mrb[0].mxu0 }
 0x215   :  { %v129_v40 = vadd.f32 %v247_v38, %v128_v39  ;;  %v271_v41 = vpop.f32.mrb[1].mxu0 }
 0x216   :  { %v131_v42 = vpop.f32.mrb[2].mxu0 }
 0x217   :  { %v137_v43 = vmul.f32 0.70710677, %v129_v40  ;;  %v132_v44 = vadd.f32 %v247_v38, %v131_v42  ;;  %v272_v45 = vpop.f32.mrb[3].mxu0  ;;  %v135_v50 = vmul.f32 0.5, %v129_v40 }
 0x219   :  { %300 = verf.f32 %v137_v43  ;;  %v138_v46 = vmul.f32 0.70710677, %v132_v44  ;;  %v136_v51 = vmul.f32 0.5, %v132_v44 }
 0x21b   :  { %302 = verf.f32 %v138_v46 }
 0x223   :  { %v301_v47 = vpop.eup %300 }
 0x224   :  { %v141_v48 = vadd.f32 1.0, %v301_v47 }
 0x225   :  { %v303_v49 = vpop.eup %302 }
 0x226   :  { %v142_v52 = vadd.f32 1.0, %v303_v49  ;;  %v143_v53 = vmul.f32 %v141_v48, %v135_v50 }
 0x228   :  { %v144_v54 = vmul.f32 %v142_v52, %v136_v51 }
 0x22a   :  { %v145_v55 = vpack.c.bf16 %v144_v54, %v143_v53 }
 0x22c   :  { %282 = vmatmul.mubr.msk.bf16.vlgmr.msra.gmra.mrb[0].mxu1 %vm182_vm2, %v145_v55 }
 0x2ff   :  { %v220_v57 = vpop.f32.mrb[0].mxu1 }
 0x300   :  { %v221_v58 = vadd.f32 %v251_v56, %v220_v57  ;;  %v283_v59 = vpop.f32.mrb[1].mxu1 }
 0x301   :  { %v223_v60 = vpop.f32.mrb[2].mxu1 }
 0x302   :  { %227 = vst.msk [vmem:[#allocation2] sm:$0xff] %vm27_vm0, %v221_v58  ;;  %v224_v61 = vadd.f32 %v251_v56, %v223_v60  ;;  %v284_v62 = vpop.f32.mrb[3].mxu1 }
 0x304   :  { %228 = vst.msk [vmem:[#allocation2 + $0x8] sm:$0xff] %vm27_vm0, %v224_v61 }
 0x305   :  { %315 = shalt.err (!%p312_p4)
}
 0x306   :  { %s316_s17 = scalar_lea.hbm %s423_s5, 256 }
 0x307   :  { %p317_p5 = scmp.ne.s32.totalorder %s423_s5, %s316_s17  ;;  %p320_p6 = scmp.lt.u32.totalorder %s316_s17, %s423_s5 }
 0x309   :  { %p322_p7 = pnand %p320_p6, %p317_p5 }
 0x30b   :  { %325 = shalt.err (!%p322_p7)
}
 0x30c   :  { %s331_s0 = smov 128   ;;  %s332_s22 = smov 8  }
 0x30d   :  { %240 = dma.vmem_to_hbm [thread:$0]  %s235_s14, 256, %s423_s5, [#allocation3], %s331_s0, %s331_s0, %s332_s22  }
 0x30e   :  { %326 = dma.done.wait [#allocation3], 256  }
 0x30f   :  { %327 = vsyncadd [#allocation3], 4294967040 }
 0x310   :  { %244 = vsyncpa [#allocation3], 1 }

</bundles_post_ra>
